<compile_context>
chip_gen: v7x
topology: tpu7x:2x2x1
jax: 0.10.0
libtpu: 0.0.40
codegen_flags: <defaults>
</compile_context>

<pallas_src>
import math
from functools import partial

import jax
import jax.numpy as jnp
from jax.experimental import pallas as pl
from jax.experimental.pallas import tpu as pltpu

_LANES = 128          # lane-dense last dim
_MAX_TM = 1024        # rows per block: 1024 * 128 * 4 B = 512 KiB per buffer


def _copy_kernel(x_ref, o_ref):
    """Identity materialization of one lane-dense tile."""
    o_ref[...] = x_ref[...]


def _round_up(x: int, m: int) -> int:
    return (x + m - 1) // m * m


@partial(jax.jit, donate_argnums=(0,))
def _fused_identity_copy(flat2d: jax.Array) -> jax.Array:
    """Tiled identity copy of a (R, 128) f32 slab; R is a multiple of the tile."""
    rows, lanes = flat2d.shape
    tm = min(_MAX_TM, rows)           # rows is already padded to a multiple of tm
    grid = (rows // tm,)
    return pl.pallas_call(
        _copy_kernel,
        out_shape=jax.ShapeDtypeStruct((rows, lanes), flat2d.dtype),
        grid=grid,
        in_specs=[pl.BlockSpec((tm, lanes), lambda i: (i, 0))],
        out_specs=pl.BlockSpec((tm, lanes), lambda i: (i, 0)),
        input_output_aliases={0: 0},
        compiler_params=pltpu.CompilerParams(
            dimension_semantics=("parallel",),
        ),
    )(flat2d)


def xavier_uniform(key, shape, gain):
    """Match torch.nn.init.xavier_uniform_ for a 2-D tensor.

    For shape (num_nodes, embed_size): fan_out = num_nodes, fan_in = embed_size.
    """
    fan_out, fan_in = shape
    bound = gain * math.sqrt(6.0 / (fan_in + fan_out))
    return jax.random.uniform(
        key, shape, dtype=jnp.float32, minval=-bound, maxval=bound
    )


class RelGraphEmbed:
    """JAX/Pallas port of the featureless-heterograph embedding layer."""

    def __init__(self, ntype_num_nodes: dict, embed_size: int, key):
        # gain = nn.init.calculate_gain('relu') = sqrt(2)
        gain = math.sqrt(2.0)
        self.embed_size = embed_size
        self.embeds = {}
        keys = jax.random.split(key, len(ntype_num_nodes))
        for k, (ntype, n_nodes) in zip(keys, sorted(ntype_num_nodes.items())):
            self.embeds[ntype] = xavier_uniform(k, (n_nodes, embed_size), gain)
        # TODO(synk): activation / dropout are stored but never applied in the
        # reference forward(), so they are intentionally omitted here.

    def forward(self) -> dict:
        """Return the embedding tables, materialized via one fused Pallas copy."""
        ntypes = list(self.embeds.keys())
        flats = [self.embeds[nt].reshape(-1) for nt in ntypes]
        sizes = [int(f.size) for f in flats]
        total = sum(sizes)

        # Pack everything into a single lane-dense (rows, 128) slab.
        rows = _round_up(max(total, _LANES), _LANES) // _LANES
        tm = min(_MAX_TM, _round_up(rows, 8))      # row tile, multiple of 8
        rows_padded = _round_up(rows, tm)
        padded_len = rows_padded * _LANES

        flat = jnp.concatenate(flats)
        flat = jnp.pad(flat, (0, padded_len - total))
        out_flat = _fused_identity_copy(
            flat.reshape(rows_padded, _LANES)
        ).reshape(-1)

        # Slice back per node type (static offsets -> cheap XLA slices).
        out = {}
        off = 0
        for nt, sz in zip(ntypes, sizes):
            n, d = self.embeds[nt].shape
            out[nt] = out_flat[off:off + sz].reshape(n, d)
            off += sz
        return out


if __name__ == "__main__":
    key = jax.random.PRNGKey(0)

    # Small synthetic heterograph: two node types.
    ntype_num_nodes = {"author": 16, "paper": 24}
    embed_size = 32

    module = RelGraphEmbed(ntype_num_nodes, embed_size, key)
    out = module.forward()

    # Block on results and sanity-check the forward is the identity on params.
    for ntype, table in out.items():
        jax.block_until_ready(table)
        assert table.shape == (ntype_num_nodes[ntype], embed_size)
        assert table.dtype == jnp.float32
        assert jnp.allclose(table, module.embeds[ntype]), ntype

    print("KERNEL_OK")
</pallas_src>

<mosaic_0001>
module attributes {stable_mosaic.version = 11 : i64} {
  func.func @_copy_kernel(%arg0: i32, %arg1: memref<16x128xf32, #tpu.memory_space<vmem>>, %arg2: memref<16x128xf32, #tpu.memory_space<vmem>>) attributes {dimension_semantics = [#tpu.dimension_semantics<parallel>], iteration_bounds = array<i64: 1>, scalar_prefetch = 0 : i64, scratch_operands = 0 : i64, tpu.core_type = #tpu.core_type<tc>, window_params = [{transform_indices = @transform_0, window_bounds = array<i64: 16, 128>}, {transform_indices = @transform_1, window_bounds = array<i64: 16, 128>}]} {
    %c0 = arith.constant 0 : index
    %c0_0 = arith.constant 0 : index
    %0 = vector.load %arg1[%c0, %c0_0] : memref<16x128xf32, #tpu.memory_space<vmem>>, vector<16x128xf32>
    %c0_1 = arith.constant 0 : index
    %c0_2 = arith.constant 0 : index
    %1 = vector.load %arg2[%c0_1, %c0_2] : memref<16x128xf32, #tpu.memory_space<vmem>>, vector<16x128xf32>
    tpu.vector_store %arg2[%c0_1, %c0_2], %0 {strides = array<i32>} : memref<16x128xf32, #tpu.memory_space<vmem>>, vector<16x128xf32>,
    return
  }
  func.func @transform_0(%arg0: i32) -> (i32, i32) {
    %c0_i32 = arith.constant 0 : i32
    %c0_i32_0 = arith.constant 0 : i32
    return %arg0, %c0_i32 : i32, i32
  }
  func.func @transform_1(%arg0: i32) -> (i32, i32) {
    %c0_i32 = arith.constant 0 : i32
    %c0_i32_0 = arith.constant 0 : i32
    return %arg0, %c0_i32 : i32, i32
  }
}

</mosaic_0001>

<bundles_post_ra>
// kernel: _fused_identity_copy.1
= control target key start
LH: loop header
LB: loop body
LE: loop exit
PB: predicated region body
PF: predicated region fallthrough
CT: control target
= control target key end

     0   :  { %6 = vsyncpa [#allocation3], 0  ;;  %s134_s0 = inlined_call_operand.hbm [shape: f32[16,128], index: 0, kind: input, shape index: {}, may-alias: {0,1}]   ;;  %s135_s1 = inlined_call_operand.hbm [shape: f32[16,128], index: 1, kind: output, shape index: {}, may-alias: {0,1}]  }
   0x1   :  { %7 = vsyncpa [#allocation4], 0  ;;  %s96_s6 = smov [#allocation2]   ;;  %s48_s10 = scalar_lea.hbm %s134_s0, 256 }
   0x2   :  { %s13_s7 = sshll.u32 %s96_s6, 4  ;;  %p49_p0 = scmp.ne.s32.totalorder %s134_s0, %s48_s10  ;;  %s14_s7 = int_to_ptr.vmem [resolvable:$true] %s13_s7 }
   0x3   :  { %p52_p1 = scmp.lt.u32.totalorder %s48_s10, %s134_s0 }
   0x5   :  { %p54_p2 = pnand %p52_p1, %p49_p0 }
   0x7   :  { %57 = shalt.err (!%p54_p2)
}
   0x8   :  { %s58_s15 = scalar_lea.vmem %s14_s7, 256  ;;  %p63_p4 = scmp.lt.s32.totalorder %s14_s7, %s14_s7 }
   0x9   :  { %p59_p3 = scmp.ne.s32.totalorder %s14_s7, %s58_s15  ;;  %p64_p5 = scmp.lt.s32.totalorder %s58_s15, %s58_s15 }
   0xb   :  { %p65_p6 = por %p64_p5, %p63_p4 }
   0xd   :  { %p66_p7 = pnand %p65_p6, %p59_p3 }
   0xf   :  { %69 = shalt.err (!%p66_p7)
}
  0x10   :  { %s97_s16 = smov 128   ;;  %s98_s17 = smov 8  }
  0x11   :  { %19 = dma.hbm_to_vmem [thread:$0]  %s134_s0, 256, %s14_s7, [#allocation3], %s97_s16, %s97_s16, %s98_s17  }
  0x12   :  { %92 = dma.done.wait [#allocation3], 256  }
  0x13   :  { %93 = vsyncadd [#allocation3], 4294967040  ;;  %s99_s20 = smov [#allocation5]   ;;  %v23_v0 = vld [vmem:[#allocation2] sm:$0xff]  ;;  %v24_v1 = vld [vmem:[#allocation2 + $0x8] sm:$0xff] }
  0x14   :  { %s32_s21 = sshll.u32 %s99_s20, 4  ;;  %25 = vst [vmem:[#allocation5] sm:$0xff] %v23_v0  ;;  %26 = vst [vmem:[#allocation5 + $0x8] sm:$0xff] %v24_v1  ;;  %s33_s21 = int_to_ptr.vmem [resolvable:$true] %s32_s21 }
  0x15   :  { %s70_s22 = scalar_lea.vmem %s33_s21, 256  ;;  %p75_p9 = scmp.lt.s32.totalorder %s33_s21, %s33_s21 }
  0x16   :  { %p71_p8 = scmp.ne.s32.totalorder %s33_s21, %s70_s22  ;;  %p76_p10 = scmp.lt.s32.totalorder %s70_s22, %s70_s22 }
  0x18   :  { %p77_p11 = por %p76_p10, %p75_p9 }
  0x1a   :  { %p78_p12 = pnand %p77_p11, %p71_p8 }
  0x1c   :  { %81 = shalt.err (!%p78_p12)
}
  0x1d   :  { %s82_s0 = scalar_lea.hbm %s135_s1, 256 }
  0x1e   :  { %p83_p13 = scmp.ne.s32.totalorder %s135_s1, %s82_s0  ;;  %p86_p0 = scmp.lt.u32.totalorder %s82_s0, %s135_s1 }
  0x20   :  { %p88_p1 = pnand %p86_p0, %p83_p13 }
  0x22   :  { %91 = shalt.err (!%p88_p1)
}
  0x23   :  { %38 = dma.vmem_to_hbm [thread:$0]  %s33_s21, 256, %s135_s1, [#allocation4], %s97_s16, %s97_s16, %s98_s17  }
  0x24   :  { %94 = dma.done.wait [#allocation4], 256  }
  0x25   :  { %95 = vsyncadd [#allocation4], 4294967040 }
  0x26   :  { %42 = vsyncpa [#allocation3], 1 }
  0x27   :  { %43 = vsyncpa [#allocation4], 1 }

</bundles_post_ra>
